<compile_context>
chip_gen: v6e
topology: v6e:2x2x1
jax: 0.10.0
libtpu: 0.0.40
codegen_flags: <defaults>
</compile_context>

<pallas_src>
import functools

import jax
import jax.numpy as jnp
from jax.experimental import pallas as pl
from jax.experimental.pallas import tpu as pltpu

EPS = 1e-6   # timm ViT LayerNorm eps


def _vmem_limit_bytes():
    # Generation-aware scoped VMEM limit: ~3/4 of physical capacity, capped at
    # 96 MiB (=> 96 MiB on 128 MiB v5e/v6e, 48 MiB on 64 MiB v7x).
    try:
        cap = int(pltpu.get_tpu_info().vmem_capacity_bytes)
        return min((cap * 3) // 4, 96 * 1024 * 1024)
    except Exception:
        return 48 * 1024 * 1024   # safe everywhere


VMEM_LIMIT = _vmem_limit_bytes()


def _layernorm(x, g, b):
    mu = jnp.mean(x, axis=-1, keepdims=True)
    var = jnp.mean(jnp.square(x - mu), axis=-1, keepdims=True)
    return (x - mu) * jax.lax.rsqrt(var + EPS) * g + b


# -------- patch embedding: Conv2d(C, D, kernel=P, stride=P) == im2col @ W -----
def _patch_embed_kernel(p_ref, w_ref, b_ref, o_ref):
    o_ref[...] = (
        jnp.dot(p_ref[...].astype(jnp.bfloat16), w_ref[...],
                preferred_element_type=jnp.float32)
        + b_ref[...]
    )


def patch_embed(patches, w, b):
    # patches: (M, K) f32, w: (K, D) bf16, b: (1, D) f32  -> (M, D) f32
    M, K = patches.shape
    D = w.shape[1]
    tm = min(M, 512)                       # row tile; full array at small shapes
    return pl.pallas_call(
        _patch_embed_kernel,
        out_shape=jax.ShapeDtypeStruct((M, D), jnp.float32),
        grid=(pl.cdiv(M, tm),),
        in_specs=[pl.BlockSpec((tm, K), lambda i: (i, 0)),
                  pl.BlockSpec((K, D), lambda i: (0, 0)),
                  pl.BlockSpec((1, D), lambda i: (0, 0))],
        out_specs=pl.BlockSpec((tm, D), lambda i: (i, 0)),
        compiler_params=pltpu.CompilerParams(
            dimension_semantics=("parallel",),
            vmem_limit_bytes=VMEM_LIMIT),
    )(patches, w, b)


# -------- one transformer encoder block (pre-LN attention + MLP) --------------
def _block_kernel(x_ref, ln1g_ref, ln1b_ref, wqkv_ref, bqkv_ref, wproj_ref,
                  bproj_ref, ln2g_ref, ln2b_ref, w1_ref, b1_ref, w2_ref, b2_ref,
                  o_ref, *, seq_len):
    bf16 = jnp.bfloat16
    B, Tp, D = x_ref.shape
    S3, _, hd = wqkv_ref.shape                    # (3H, D, hd) head-major weights
    H = S3 // 3
    M = B * Tp
    scale = 1.0 / (hd ** 0.5)

    # Batch folded into the matmul M dimension (reshape only splits/merges
    # leading sublane-aligned dims; Tp is a multiple of 8).
    x = x_ref[...].reshape(M, D)                                       # f32 slab

    # --- multi-head self-attention ---
    xn = _layernorm(x, ln1g_ref[...], ln1b_ref[...])                   # f32
    xn_b = jnp.broadcast_to(xn.astype(bf16), (S3, M, D))
    # head-major q/k/v via one batched matmul; no lane-offset slicing / reshape.
    qkv = (jnp.einsum('smd,sde->sme', xn_b, wqkv_ref[...],
                      preferred_element_type=jnp.float32)
           + bqkv_ref[...])                                            # (3H, M, hd)
    q = (qkv[:H] * scale).reshape(H * B, Tp, hd).astype(bf16)          # scale folded in
    k = qkv[H:2 * H].reshape(H * B, Tp, hd).astype(bf16)
    v = qkv[2 * H:].reshape(H * B, Tp, hd).astype(bf16)

    s = jnp.einsum('gqe,gke->gqk', q, k,
                   preferred_element_type=jnp.float32)                 # (H*B,Tp,Tp)
    if Tp != seq_len:   # mask padded key positions (static branch, additive bias)
        kidx = jax.lax.broadcasted_iota(jnp.int32, (1, 1, Tp), 2)
        s = s + jnp.where(kidx < seq_len, 0.0, -1e30)
    s = s - jnp.max(s, axis=-1, keepdims=True)
    e = jnp.exp(s)
    p = e * pl.reciprocal(jnp.sum(e, axis=-1, keepdims=True), approx=True)
    o = jnp.einsum('gqk,gke->gqe', p.astype(bf16), v,
                   preferred_element_type=jnp.float32)                 # (H*B,Tp,hd)

    # output projection with head-major proj weight: per-head matmul + sum over heads
    o_h = o.reshape(H, M, hd).astype(bf16)
    per_head = jnp.einsum('hme,hef->hmf', o_h, wproj_ref[...],
                          preferred_element_type=jnp.float32)          # (H, M, D)
    x = x + jnp.sum(per_head, axis=0) + bproj_ref[...]

    # --- MLP ---
    xn2 = _layernorm(x, ln2g_ref[...], ln2b_ref[...])
    h1 = jnp.dot(xn2.astype(bf16), w1_ref[...],
                 preferred_element_type=jnp.float32) + b1_ref[...]
    # TODO(synk): timm uses exact (erf) GELU; tanh approximation used for safe lowering.
    h1 = jax.nn.gelu(h1, approximate=True)
    x = x + jnp.dot(h1.astype(bf16), w2_ref[...],
                    preferred_element_type=jnp.float32) + b2_ref[...]

    o_ref[...] = x.reshape(B, Tp, D)


_BLOCK_KEYS = ('ln1_g', 'ln1_b', 'wqkv_hm', 'bqkv_hm', 'wproj_hm', 'bproj',
               'ln2_g', 'ln2_b', 'w1', 'b1', 'w2', 'b2')


def _full_spec(arr):
    zeros = (0,) * arr.ndim
    return pl.BlockSpec(arr.shape, lambda i: zeros)


def encoder_block(x, p, *, seq_len):
    B, Tp, D = x.shape
    # TODO(synk): at real vit_base scale (D=768, mlp=3072) put
    # pipeline_mode=pl.Buffered(1) on the grid-invariant weight specs and/or add
    # an "arbitrary" hidden-dim reduction grid axis for w1/w2 so double-buffered
    # weights fit v7x's 64 MiB VMEM.
    # TODO(synk): on v7x (2 TensorCores) split the B*Tp rows (or heads) across a
    # 2-wide "parallel" grid axis so both cores get work; a single step uses one.
    return pl.pallas_call(
        functools.partial(_block_kernel, seq_len=seq_len),
        out_shape=jax.ShapeDtypeStruct((B, Tp, D), jnp.float32),
        grid=(1,),
        in_specs=[pl.BlockSpec((B, Tp, D), lambda i: (0, 0, 0))] +
                 [_full_spec(p[k]) for k in _BLOCK_KEYS],
        out_specs=pl.BlockSpec((B, Tp, D), lambda i: (0, 0, 0)),
        compiler_params=pltpu.CompilerParams(
            dimension_semantics=("arbitrary",),
            vmem_limit_bytes=VMEM_LIMIT),
    )(x, *(p[k] for k in _BLOCK_KEYS))


# -------- fused final LayerNorm (backbone.norm) + classifier head --------------
def _norm_head_kernel(x_ref, g_ref, b_ref, w_ref, fb_ref, xn_ref, logit_ref):
    xn = _layernorm(x_ref[...], g_ref[...], b_ref[...])        # (B, Tp, D) f32
    xn_ref[...] = xn
    cls = xn[:, 0, :]                                          # (B, D) CLS rows
    logit_ref[...] = jnp.dot(cls.astype(jnp.bfloat16), w_ref[...],
                             preferred_element_type=jnp.float32) + fb_ref[...]


def final_norm_head(x, g, b, fc_w, fc_b):
    B, Tp, D = x.shape
    C = fc_w.shape[1]
    xn, logits = pl.pallas_call(
        _norm_head_kernel,
        out_shape=(jax.ShapeDtypeStruct((B, Tp, D), jnp.float32),
                   jax.ShapeDtypeStruct((B, C), jnp.float32)),
        grid=(1,),
        in_specs=[pl.BlockSpec((B, Tp, D), lambda i: (0, 0, 0)),
                  pl.BlockSpec(g.shape, lambda i: (0, 0)),
                  pl.BlockSpec(b.shape, lambda i: (0, 0)),
                  pl.BlockSpec(fc_w.shape, lambda i: (0, 0)),
                  pl.BlockSpec(fc_b.shape, lambda i: (0, 0))],
        out_specs=(pl.BlockSpec((B, Tp, D), lambda i: (0, 0, 0)),
                   pl.BlockSpec((B, C), lambda i: (0, 0))),
        compiler_params=pltpu.CompilerParams(
            dimension_semantics=("arbitrary",),
            vmem_limit_bytes=VMEM_LIMIT),
    )(x, g, b, fc_w, fc_b)
    return xn, logits


# -------- parameter construction (deterministic, synthetic) --------------------
def init_params(key, *, C, P, D, depth, mlp, T, num_classes):
    keys = jax.random.split(key, 4 + depth)

    def nrm(k, shp):
        return (0.02 * jax.random.normal(k, shp)).astype(jnp.float32)

    params = {
        'patch_w': nrm(keys[0], (C * P * P, D)),
        'patch_b': jnp.zeros((1, D), jnp.float32),
        'cls': nrm(keys[1], (1, 1, D)),
        'pos': nrm(keys[2], (1, T, D)),
        'norm_g': jnp.ones((1, D), jnp.float32),
        'norm_b': jnp.zeros((1, D), jnp.float32),
        'fc_w': nrm(keys[3], (D, num_classes)),
        'fc_b': jnp.zeros((1, num_classes), jnp.float32),
        'blocks': [],
    }
    for i in range(depth):
        bk = jax.random.split(keys[4 + i], 4)
        params['blocks'].append({
            'ln1_g': jnp.ones((1, D), jnp.float32),
            'ln1_b': jnp.zeros((1, D), jnp.float32),
            'wqkv': nrm(bk[0], (D, 3 * D)),
            'bqkv': jnp.zeros((1, 3 * D), jnp.float32),
            'wproj': nrm(bk[1], (D, D)),
            'bproj': jnp.zeros((1, D), jnp.float32),
            'ln2_g': jnp.ones((1, D), jnp.float32),
            'ln2_b': jnp.zeros((1, D), jnp.float32),
            'w1': nrm(bk[2], (D, mlp)),
            'b1': jnp.zeros((1, mlp), jnp.float32),
            'w2': nrm(bk[3], (mlp, D)),
            'b2': jnp.zeros((1, D), jnp.float32),
        })
    return params


def prepare_params(params, num_heads):
    """Wrapper-side layout + dtype transform:
       * MXU weights cast to bf16 (f32 accumulation in-kernel),
       * QKV / proj weights re-laid-out head-major so the kernel never slices
         or reshapes the lane dimension."""
    out = dict(params)
    out['patch_w'] = params['patch_w'].astype(jnp.bfloat16)
    out['fc_w'] = params['fc_w'].astype(jnp.bfloat16)
    blocks = []
    for bp in params['blocks']:
        D = bp['wqkv'].shape[0]
        H = num_heads
        hd = D // H
        wqkv_hm = (bp['wqkv'].reshape(D, 3, H, hd)     # columns ordered (qkv, head, hd)
                   .transpose(1, 2, 0, 3)              # (3, H, D, hd)
                   .reshape(3 * H, D, hd))
        bqkv_hm = bp['bqkv'].reshape(3 * H, 1, hd)
        wproj_hm = bp['wproj'].reshape(H, hd, D)
        blocks.append({
            'ln1_g': bp['ln1_g'], 'ln1_b': bp['ln1_b'],
            'wqkv_hm': wqkv_hm.astype(jnp.bfloat16),
            'bqkv_hm': bqkv_hm,
            'wproj_hm': wproj_hm.astype(jnp.bfloat16),
            'bproj': bp['bproj'],
            'ln2_g': bp['ln2_g'], 'ln2_b': bp['ln2_b'],
            'w1': bp['w1'].astype(jnp.bfloat16), 'b1': bp['b1'],
            'w2': bp['w2'].astype(jnp.bfloat16), 'b2': bp['b2'],
        })
    out['blocks'] = blocks
    return out


# -------- ViTNet.forward --------------------------------------------------------
def vit_forward(x, params, *, patch):
    B, C, Himg, Wimg = x.shape
    P = patch
    nh, nw = Himg // P, Wimg // P
    N = nh * nw
    T = N + 1
    D = params['patch_w'].shape[1]

    # im2col matching Conv2d weight flatten order (C, kh, kw) — plain-JAX glue.
    patches = (x.reshape(B, C, nh, P, nw, P)
                 .transpose(0, 2, 4, 1, 3, 5)
                 .reshape(B * N, C * P * P))
    tok = patch_embed(patches, params['patch_w'], params['patch_b']).reshape(B, N, D)

    # _pos_embed: prepend class token, add position embedding (glue, plain JAX).
    cls = jnp.broadcast_to(params['cls'], (B, 1, D))
    xseq = jnp.concatenate([cls, tok], axis=1) + params['pos']       # (B, T, D)

    # pad the sequence to a sublane multiple; padded keys are masked in-kernel.
    Tp = ((T + 7) // 8) * 8
    if Tp != T:
        xseq = jnp.pad(xseq, ((0, 0), (0, Tp - T), (0, 0)))

    fmaps = []
    # TODO(synk): at real scale / small batch this loop is weight-bandwidth-bound
    # on v5e/v6e; stream the next block's weights with pltpu.emit_pipeline (or a
    # depth grid axis + scalar-prefetched weight indexing) to overlap weight DMA
    # with the current block's compute.
    for bp in params['blocks']:
        xseq = encoder_block(xseq, bp, seq_len=T)
        fmaps.append(xseq[:, :T])

    xn_pad, logits = final_norm_head(xseq, params['norm_g'], params['norm_b'],
                                     params['fc_w'], params['fc_b'])
    xn = xn_pad[:, :T]
    return {'logits': logits,
            'fmaps': fmaps,
            'features': xn[:, 0],
            'img_features': xn[:, 1:],
            'all_features': xn}


if __name__ == "__main__":
    # Small shapes consistent with the ViT forward (scaled-down vit_base):
    B, C, H, W = 2, 3, 16, 16
    P, D, depth, num_heads, mlp, num_classes = 4, 32, 2, 4, 128, 10
    T = (H // P) * (W // P) + 1          # 16 patches + 1 cls token = 17

    key = jax.random.PRNGKey(0)
    kx, kp = jax.random.split(key)
    x = jax.random.normal(kx, (B, C, H, W), jnp.float32)
    params = prepare_params(
        init_params(kp, C=C, P=P, D=D, depth=depth, mlp=mlp, T=T,
                    num_classes=num_classes),
        num_heads=num_heads)

    out = vit_forward(x, params, patch=P)
    jax.block_until_ready(out['logits'])

    assert out['features'].shape == (B, D)
    assert out['img_features'].shape == (B, T - 1, D)
    assert out['all_features'].shape == (B, T, D)
    assert len(out['fmaps']) == depth
    assert all(f.shape == (B, T, D) for f in out['fmaps'])
    assert out['logits'].shape == (B, num_classes)
    print("KERNEL_OK")
</pallas_src>

<mosaic_0001>
module attributes {stable_mosaic.version = 11 : i64} {
  func.func @_patch_embed_kernel(%arg0: i32, %arg1: memref<32x48xf32, #tpu.memory_space<vmem>>, %arg2: memref<48x32xbf16, #tpu.memory_space<vmem>>, %arg3: memref<1x32xf32, #tpu.memory_space<vmem>>, %arg4: memref<32x32xf32, #tpu.memory_space<vmem>>) attributes {dimension_semantics = [#tpu.dimension_semantics<parallel>], iteration_bounds = array<i64: 1>, scalar_prefetch = 0 : i64, scratch_operands = 0 : i64, tpu.core_type = #tpu.core_type<tc>, window_params = [{transform_indices = @transform_0, window_bounds = array<i64: 32, 48>}, {pipeline_mode = #tpu.pipeline_mode<synchronous>, transform_indices = @transform_1, window_bounds = array<i64: 48, 32>}, {pipeline_mode = #tpu.pipeline_mode<synchronous>, transform_indices = @transform_2, window_bounds = array<i64: 1, 32>}, {transform_indices = @transform_3, window_bounds = array<i64: 32, 32>}]} {
    %c0 = arith.constant 0 : index
    %c0_0 = arith.constant 0 : index
    %0 = vector.load %arg1[%c0, %c0_0] : memref<32x48xf32, #tpu.memory_space<vmem>>, vector<32x48xf32>
    %1 = arith.truncf %0 : vector<32x48xf32> to vector<32x48xbf16>
    %c0_1 = arith.constant 0 : index
    %c0_2 = arith.constant 0 : index
    %2 = vector.load %arg2[%c0_1, %c0_2] : memref<48x32xbf16, #tpu.memory_space<vmem>>, vector<48x32xbf16>
    %cst = arith.constant dense<0.000000e+00> : vector<32x32xf32>
    %3 = tpu.matmul %1, %2, %cst {dimension_numbers = #tpu.dot_dimension_numbers<[1], [0], [0], [1], [0, 0, 1, 1], [], []>} : vector<32x48xbf16>, vector<48x32xbf16>, vector<32x32xf32> -> vector<32x32xf32>
    %c0_3 = arith.constant 0 : index
    %c0_4 = arith.constant 0 : index
    %4 = vector.load %arg3[%c0_3, %c0_4] : memref<1x32xf32, #tpu.memory_space<vmem>>, vector<1x32xf32>
    %5 = vector.broadcast %4 : vector<1x32xf32> to vector<32x32xf32>
    %6 = arith.addf %3, %5 : vector<32x32xf32>
    %c0_5 = arith.constant 0 : index
    %c0_6 = arith.constant 0 : index
    %7 = vector.load %arg4[%c0_5, %c0_6] : memref<32x32xf32, #tpu.memory_space<vmem>>, vector<32x32xf32>
    tpu.vector_store %arg4[%c0_5, %c0_6], %6 {strides = array<i32>} : memref<32x32xf32, #tpu.memory_space<vmem>>, vector<32x32xf32>,
    return
  }
  func.func @transform_0(%arg0: i32) -> (i32, i32) {
    %c0_i32 = arith.constant 0 : i32
    %c0_i32_0 = arith.constant 0 : i32
    return %arg0, %c0_i32 : i32, i32
  }
  func.func @transform_1(%arg0: i32) -> (i32, i32) {
    %c0_i32 = arith.constant 0 : i32
    %c0_i32_0 = arith.constant 0 : i32
    %c0_i32_1 = arith.constant 0 : i32
    return %c0_i32, %c0_i32_0 : i32, i32
  }
  func.func @transform_2(%arg0: i32) -> (i32, i32) {
    %c0_i32 = arith.constant 0 : i32
    %c0_i32_0 = arith.constant 0 : i32
    %c0_i32_1 = arith.constant 0 : i32
    return %c0_i32, %c0_i32_0 : i32, i32
  }
  func.func @transform_3(%arg0: i32) -> (i32, i32) {
    %c0_i32 = arith.constant 0 : i32
    %c0_i32_0 = arith.constant 0 : i32
    return %arg0, %c0_i32 : i32, i32
  }
}

</mosaic_0001>

<bundles_post_ra>
// kernel: tpu_custom_call.1
= control target key start
LH: loop header
LB: loop body
LE: loop exit
PB: predicated region body
PF: predicated region fallthrough
CT: control target
= control target key end

     0   :  { %vm53_vm0 = vcmask 392192   ;;  %s229_s0 = inlined_call_operand.vmem [shape: f32[32,48], index: 0, kind: input, shape index: {}]   ;;  %s230_s1 = inlined_call_operand.vmem [shape: bf16[48,32], index: 1, kind: input, shape index: {}]   ;;  %s231_s2 = inlined_call_operand.vmem [shape: f32[1,32], index: 2, kind: input, shape index: {}]   ;;  %s232_s3 = inlined_call_operand.hbm [shape: f32[32,32], index: 3, kind: output, shape index: {}]  }
   0x1   :  { %v154_v0 = vld [vmem:[%s230_s1 + $0x10] sm:$0xff]   ;;  %v155_v1 = vld [vmem:[%s230_s1 + $0x8] sm:$0xff]   ;;  %v16_v2 = vld [vmem:[%s229_s0] sm:$0xff] }
   0x2   :  { %141 = vmatprep.subr.bf16.mxu0 %v154_v0  ;;  %v17_v3 = vld [vmem:[%s229_s0 + $0x8] sm:$0xff]  ;;  %v156_v4 = vld [vmem:[%s230_s1] sm:$0xff]  }
   0x3   :  { %142 = vmatpush3.bf16.msra.mxu0 %v154_v0  ;;  %v20_v5 = vpack.c.bf16 %v17_v3, %v16_v2 }
   0x4   :  { %143 = vmatprep.subr.bf16.mxu0 %v155_v1 }
   0x5   :  { %8 = vsyncpa [#allocation3], 0  ;;  %147 = vmatprep.mubr.msk.bf16.mxu0 %vm53_vm0, %v20_v5  ;;  %v18_v6 = vld [vmem:[%s229_s0 + $0x10] sm:$0xff]  ;;  %v19_v7 = vld [vmem:[%s229_s0 + $0x18] sm:$0xff]  ;;  %vm109_vm1 = vcmask 261120   ;;  %s179_s1 = smov [#allocation2]  }
   0x6   :  { %v21_v8 = vpack.c.bf16 %v19_v7, %v18_v6  ;;  %v130_v9 = vld [vmem:[%s231_s2] ss:$0 sm:$0xff]  ;;  %s119_s28 = sshll.u32 %s179_s1, 4  ;;  %s120_s28 = int_to_ptr.vmem [resolvable:$true] %s119_s28 }
   0x7   :  { %144 = vmatpush3.bf16.msra.mxu0 %v155_v1  ;;  %s157_s0 = scalar_lea.vmem %s120_s28, 512  ;;  %p162_p1 = scmp.lt.s32.totalorder %s120_s28, %s120_s28 }
   0x8   :  { %145 = vmatprep.subr.bf16.mxu0 %v156_v4  ;;  %p158_p0 = scmp.ne.s32.totalorder %s120_s28, %s157_s0  ;;  %p163_p2 = scmp.lt.s32.totalorder %s157_s0, %s157_s0 }
   0xa   :  { %p164_p3 = por %p163_p2, %p162_p1 }
   0xb   :  { %146 = vmatpush3.bf16.msra.mxu0 %v156_v4 }
   0xc   :  { %p165_p4 = pnand %p164_p3, %p158_p0 }
   0xe   :  { %148 = vmatmul.mubr.msk.bf16.vlgmr.msra.gmra.mxu0 %vm53_vm0, %v21_v8 }
  0xce   :  { %v149_v10 = vpop.f32.mrf.mxu0 }
  0xcf   :  { %v103_v11 = vadd.f32 %v149_v10, %v130_v9 }
  0xd0   :  { %v94_v12 = vpop.f32.mrf.mxu0 }
  0xd1   :  { %112 = vst.msk [vmem:[#allocation2 + $0x10] sm:$0xff] %vm109_vm1, %v103_v11  ;;  %v95_v13 = vadd.f32 %v130_v9, %v94_v12 }
  0xd2   :  { %v150_v14 = vpop.f32.mrf.mxu0 }
  0xd3   :  { %110 = vst.msk [vmem:[#allocation2] sm:$0xff] %vm109_vm1, %v95_v13  ;;  %v106_v15 = vadd.f32 %v150_v14, %v130_v9 }
  0xd4   :  { %v97_v16 = vpop.f32.mrf.mxu0 }
  0xd5   :  { %113 = vst.msk [vmem:[#allocation2 + $0x18] sm:$0xff] %vm109_vm1, %v106_v15  ;;  %v98_v17 = vadd.f32 %v130_v9, %v97_v16 }
  0xd7   :  { %111 = vst.msk [vmem:[#allocation2 + $0x8] sm:$0xff] %vm109_vm1, %v98_v17 }
  0xd8   :  { %168 = shalt.err (!%p165_p4)
}
  0xd9   :  { %s180_s2 = smov 128   ;;  %s181_s29 = smov 8  }
  0xda   :  { %125 = dma.vmem_to_hbm [thread:$0]  %s120_s28, 512, %s232_s3, [#allocation3], %s180_s2, %s180_s2, %s181_s29  }
  0xdb   :  { %177 = dma.done.wait [#allocation3], 512  }
  0xdc   :  { %178 = vsyncadd [#allocation3], 4294966784 }
  0xdd   :  { %129 = vsyncpa [#allocation3], 1 }

</bundles_post_ra>
